<compile_context>
chip_gen: v7x
topology: tpu7x:2x2x1
jax: 0.10.0
libtpu: 0.0.40
codegen_flags: <defaults>
</compile_context>

<pallas_src>
import math
import jax
import jax.numpy as jnp
from jax.experimental import pallas as pl
from jax.experimental.pallas import tpu as pltpu


def _round_up(x, m):
    return (x + m - 1) // m * m


def _cdiv(a, b):
    return (a + b - 1) // b


def _vmem_budget_bytes():
    """~75% of physical VMEM (48 MiB on v7x, 96 MiB on v5e/v6e); safe fallback."""
    phys = 64 << 20  # conservative fallback (v7x physical)
    try:
        info = pltpu.get_tpu_info()
        phys = int(getattr(info, "vmem_capacity_bytes", phys))
    except Exception:
        pass
    return (phys // 4) * 3


# ---------------------------------------------------------------------------
# Kernels
# ---------------------------------------------------------------------------
def _ffn_resident_kernel(x_ref, w1_ref, b1_ref, w2_ref, b2_ref, o_ref):
    """Grid = (row tiles,).  Full W1/W2 are VMEM-resident (constant block index)."""
    cdt = w1_ref.dtype
    x = x_ref[...].astype(cdt)                      # in-kernel cast: x arrives f32
    h = jnp.dot(x, w1_ref[...], preferred_element_type=jnp.float32)
    h = jnp.maximum(h + b1_ref[...].astype(jnp.float32), 0.0)
    # TODO(synk): training-mode dropout (pltpu.prng_seed/prng_random_bits) not
    # implemented; identity == eval mode.
    y = jnp.dot(h.astype(cdt), w2_ref[...], preferred_element_type=jnp.float32)
    o_ref[...] = (y + b2_ref[...].astype(jnp.float32)).astype(o_ref.dtype)


def _ffn_streaming_kernel(x_ref, w1_ref, b1_ref, w2_ref, b2_ref, o_ref, acc_ref):
    """Grid = (row tiles, d_ff tiles).  Accumulate the second matmul over d_ff
    into an f32 VMEM scratch; init with b2, write out on the last step."""
    j = pl.program_id(1)
    cdt = w1_ref.dtype

    x = x_ref[...].astype(cdt)
    h = jnp.dot(x, w1_ref[...], preferred_element_type=jnp.float32)
    h = jnp.maximum(h + b1_ref[...].astype(jnp.float32), 0.0)
    y = jnp.dot(h.astype(cdt), w2_ref[...], preferred_element_type=jnp.float32)

    @pl.when(j == 0)
    def _():
        acc_ref[...] = jnp.broadcast_to(b2_ref[...].astype(jnp.float32),
                                        acc_ref.shape)

    acc_ref[...] += y

    @pl.when(j == pl.num_programs(1) - 1)
    def _():
        o_ref[...] = acc_ref[...].astype(o_ref.dtype)


# ---------------------------------------------------------------------------
# Tile planning
# ---------------------------------------------------------------------------
def _plan(M, d_model, d_ff, x_itemsize, w_itemsize, out_itemsize, budget):
    """Return (tm, tf, d_ff_pad).  tf == d_ff_pad == d_ff  <=>  resident-weight path."""
    # ---- resident path (preferred): weights counted double-buffered (conservative)
    w_foot = 2 * 2 * d_model * d_ff * w_itemsize
    b_foot = 2 * 2 * (d_ff + d_model) * w_itemsize
    for tm_try in (512, 256, 128, 64, 32, 16, 8):
        tm = min(tm_try, _round_up(M, 8))
        tiles = (2 * tm * d_model * x_itemsize          # x in (double-buffered)
                 + 2 * tm * d_model * out_itemsize      # out (double-buffered)
                 + tm * d_ff * (4 + w_itemsize)         # f32 h + its bf16 cast
                 + tm * d_model * 4)                    # epilogue headroom
        if w_foot + b_foot + tiles <= budget:
            return tm, d_ff, d_ff
    # ---- streaming fallback: prioritize large tm (weight re-fetch ~ 1/tm), then tf
    d_ff_lane = _round_up(d_ff, 128)
    for tm_try in (1024, 512, 256, 128, 64, 32, 16, 8):
        tm = min(tm_try, _round_up(M, 8))
        for tf_try in (2048, 1024, 512, 256, 128):
            tf = min(tf_try, d_ff_lane)
            d_ff_pad = _round_up(d_ff, tf)
            need = (2 * tm * d_model * x_itemsize
                    + 2 * tm * d_model * out_itemsize
                    + 2 * (d_model * tf + tf * d_model + tf) * w_itemsize
                    + tm * tf * (4 + w_itemsize)
                    + tm * d_model * 4)
            if need <= budget:
                return tm, tf, d_ff_pad
    return 8, 128, _round_up(d_ff, 128)   # last resort: tiny tiles


# ---------------------------------------------------------------------------
# Wrapper
# ---------------------------------------------------------------------------
def positionwise_feed_forward(x, w1, b1, w2, b2, *, compute_dtype=jnp.bfloat16):
    """x: (batch, seq, d_model) -> (batch, seq, d_model)."""
    B, S, d_model = x.shape
    d_ff = w1.shape[1]
    M = B * S

    x2d = x.reshape(M, d_model)                      # keep input dtype; cast in-kernel
    # Weights should already be in compute_dtype (prepare_params); these are no-ops then.
    w1c = w1.astype(compute_dtype)
    b1c = b1.reshape(1, d_ff).astype(compute_dtype)
    w2c = w2.astype(compute_dtype)
    b2c = b2.reshape(1, d_model).astype(compute_dtype)

    budget = _vmem_budget_bytes()
    w_itemsize = jnp.dtype(compute_dtype).itemsize
    tm, tf, d_ff_pad = _plan(M, d_model, d_ff,
                             x2d.dtype.itemsize, w_itemsize, x.dtype.itemsize,
                             budget)

    # Megacore (v7x has 2 TCs): make sure the parallel row axis has >= 2 blocks.
    while M > 8 and tm > 8 and _cdiv(M, tm) < 2:
        tm = _round_up(tm // 2, 8)

    n_row = _cdiv(M, tm)
    resident = (tf == d_ff_pad == d_ff)

    if (not resident) and d_ff_pad != d_ff:
        # Rare: zero-pad the hidden dim so every reduction tile is exact.
        # relu(x@0 + 0) = 0 and 0 @ W2_pad rows contribute exactly 0 -> correct.
        pad = d_ff_pad - d_ff
        w1c = jnp.pad(w1c, ((0, 0), (0, pad)))
        b1c = jnp.pad(b1c, ((0, 0), (0, pad)))
        w2c = jnp.pad(w2c, ((0, pad), (0, 0)))

    n_ff = d_ff_pad // tf

    # Advisory cost estimate (weights are re-read per row tile only when streaming).
    weight_bytes = (2 * d_model * d_ff_pad + d_ff_pad + d_model) * w_itemsize
    weight_reads = weight_bytes if n_ff == 1 else n_row * weight_bytes
    cost = pl.CostEstimate(
        flops=int(4 * M * d_model * d_ff_pad),
        transcendentals=0,
        bytes_accessed=int(M * d_model * x2d.dtype.itemsize   # x read
                           + M * d_model * x.dtype.itemsize   # out write
                           + weight_reads),
    )

    compiler_params_common = dict(vmem_limit_bytes=int(budget))

    if resident:
        out2d = pl.pallas_call(
            _ffn_resident_kernel,
            out_shape=jax.ShapeDtypeStruct((M, d_model), x.dtype),
            grid_spec=pltpu.PrefetchScalarGridSpec(
                num_scalar_prefetch=0,
                grid=(n_row,),
                in_specs=[
                    pl.BlockSpec((tm, d_model), lambda i: (i, 0)),     # x rows
                    pl.BlockSpec((d_model, d_ff), lambda i: (0, 0)),   # W1 (resident)
                    pl.BlockSpec((1, d_ff), lambda i: (0, 0)),         # b1
                    pl.BlockSpec((d_ff, d_model), lambda i: (0, 0)),   # W2 (resident)
                    pl.BlockSpec((1, d_model), lambda i: (0, 0)),      # b2
                ],
                out_specs=pl.BlockSpec((tm, d_model), lambda i: (i, 0)),
            ),
            compiler_params=pltpu.CompilerParams(
                dimension_semantics=("parallel",), **compiler_params_common),
            cost_estimate=cost,
        )(x2d, w1c, b1c, w2c, b2c)
    else:
        out2d = pl.pallas_call(
            _ffn_streaming_kernel,
            out_shape=jax.ShapeDtypeStruct((M, d_model), x.dtype),
            grid_spec=pltpu.PrefetchScalarGridSpec(
                num_scalar_prefetch=0,
                grid=(n_row, n_ff),
                in_specs=[
                    pl.BlockSpec((tm, d_model), lambda i, j: (i, 0)),   # x rows
                    pl.BlockSpec((d_model, tf), lambda i, j: (0, j)),   # W1[:, j]
                    pl.BlockSpec((1, tf),       lambda i, j: (0, j)),   # b1[j]
                    pl.BlockSpec((tf, d_model), lambda i, j: (j, 0)),   # W2[j, :]
                    pl.BlockSpec((1, d_model),  lambda i, j: (0, 0)),   # b2
                ],
                out_specs=pl.BlockSpec((tm, d_model), lambda i, j: (i, 0)),
                scratch_shapes=[pltpu.VMEM((tm, d_model), jnp.float32)],
            ),
            compiler_params=pltpu.CompilerParams(
                dimension_semantics=("parallel", "arbitrary"),
                **compiler_params_common),
            cost_estimate=cost,
        )(x2d, w1c, b1c, w2c, b2c)

    return out2d.reshape(B, S, d_model)


# ---------------------------------------------------------------------------
# Parameter helpers
# ---------------------------------------------------------------------------
def init_params(key, d_model, d_ff, dtype=jnp.float32):
    """Deterministic init mimicking PyTorch nn.Linear defaults (uniform +/- 1/sqrt(fan_in))."""
    k1, k2, k3, k4 = jax.random.split(key, 4)
    bound1 = 1.0 / math.sqrt(d_model)
    bound2 = 1.0 / math.sqrt(d_ff)
    # stored transposed vs PyTorch: (in, out)
    w1 = jax.random.uniform(k1, (d_model, d_ff), dtype, -bound1, bound1)
    b1 = jax.random.uniform(k2, (1, d_ff), dtype, -bound1, bound1)
    w2 = jax.random.uniform(k3, (d_ff, d_model), dtype, -bound2, bound2)
    b2 = jax.random.uniform(k4, (1, d_model), dtype, -bound2, bound2)
    return w1, b1, w2, b2


def prepare_params(w1, b1, w2, b2, compute_dtype=jnp.bfloat16):
    """One-time weight cast at load time so the per-call wrapper cast is a no-op."""
    return (w1.astype(compute_dtype), b1.astype(compute_dtype),
            w2.astype(compute_dtype), b2.astype(compute_dtype))


if __name__ == "__main__":
    key = jax.random.PRNGKey(0)
    batch, seq, d_model, d_ff = 2, 8, 32, 64

    kx, kp = jax.random.split(key)
    x = jax.random.normal(kx, (batch, seq, d_model), jnp.float32)
    w1, b1, w2, b2 = init_params(kp, d_model, d_ff)            # f32 "checkpoint"
    w1c, b1c, w2c, b2c = prepare_params(w1, b1, w2, b2)        # one-time bf16 cast

    out = positionwise_feed_forward(x, w1c, b1c, w2c, b2c)
    out = jax.block_until_ready(out)
    assert out.shape == (batch, seq, d_model)

    # Reference 1: pure f32 math (the PyTorch module's forward, eval-mode dropout).
    ref_f32 = jnp.maximum(x @ w1 + b1[0], 0.0) @ w2 + b2[0]
    assert jnp.allclose(out, ref_f32, atol=5e-2, rtol=5e-2)

    # Reference 2: same math on bf16-round-tripped operands (what the kernel actually
    # consumes); only the in-kernel bf16 cast of the ReLU activations differs.
    rt = lambda a: a.astype(jnp.bfloat16).astype(jnp.float32)
    ref_bf16 = (jnp.maximum(rt(x) @ rt(w1) + rt(b1)[0], 0.0) @ rt(w2)) + rt(b2)[0]
    assert jnp.allclose(out, ref_bf16, atol=2e-2, rtol=2e-2)

    print("KERNEL_OK")
</pallas_src>

<mosaic_0001>
module attributes {stable_mosaic.version = 11 : i64} {
  func.func @_ffn_resident_kernel(%arg0: i32, %arg1: memref<8x32xf32, #tpu.memory_space<vmem>>, %arg2: memref<32x64xbf16, #tpu.memory_space<vmem>>, %arg3: memref<1x64xbf16, #tpu.memory_space<vmem>>, %arg4: memref<64x32xbf16, #tpu.memory_space<vmem>>, %arg5: memref<1x32xbf16, #tpu.memory_space<vmem>>, %arg6: memref<8x32xf32, #tpu.memory_space<vmem>>) attributes {dimension_semantics = [#tpu.dimension_semantics<parallel>], iteration_bounds = array<i64: 2>, scalar_prefetch = 0 : i64, scratch_operands = 0 : i64, tpu.core_type = #tpu.core_type<tc>, window_params = [{transform_indices = @transform_0, window_bounds = array<i64: 8, 32>}, {pipeline_mode = #tpu.pipeline_mode<synchronous>, transform_indices = @transform_1, window_bounds = array<i64: 32, 64>}, {pipeline_mode = #tpu.pipeline_mode<synchronous>, transform_indices = @transform_2, window_bounds = array<i64: 1, 64>}, {pipeline_mode = #tpu.pipeline_mode<synchronous>, transform_indices = @transform_3, window_bounds = array<i64: 64, 32>}, {pipeline_mode = #tpu.pipeline_mode<synchronous>, transform_indices = @transform_4, window_bounds = array<i64: 1, 32>}, {transform_indices = @transform_5, window_bounds = array<i64: 8, 32>}]} {
    %c0 = arith.constant 0 : index
    %c0_0 = arith.constant 0 : index
    %0 = vector.load %arg1[%c0, %c0_0] : memref<8x32xf32, #tpu.memory_space<vmem>>, vector<8x32xf32>
    %1 = arith.truncf %0 : vector<8x32xf32> to vector<8x32xbf16>
    %c0_1 = arith.constant 0 : index
    %c0_2 = arith.constant 0 : index
    %2 = vector.load %arg2[%c0_1, %c0_2] : memref<32x64xbf16, #tpu.memory_space<vmem>>, vector<32x64xbf16>
    %cst = arith.constant dense<0.000000e+00> : vector<8x64xf32>
    %3 = tpu.matmul %1, %2, %cst {dimension_numbers = #tpu.dot_dimension_numbers<[1], [0], [0], [1], [0, 0, 1, 1], [], []>} : vector<8x32xbf16>, vector<32x64xbf16>, vector<8x64xf32> -> vector<8x64xf32>
    %c0_3 = arith.constant 0 : index
    %c0_4 = arith.constant 0 : index
    %4 = vector.load %arg3[%c0_3, %c0_4] : memref<1x64xbf16, #tpu.memory_space<vmem>>, vector<1x64xbf16>
    %5 = arith.extf %4 : vector<1x64xbf16> to vector<1x64xf32>
    %6 = vector.broadcast %5 : vector<1x64xf32> to vector<8x64xf32>
    %7 = arith.addf %3, %6 : vector<8x64xf32>
    %cst_5 = arith.constant 0.000000e+00 : f32
    %8 = vector.broadcast %cst_5 : f32 to vector<8x64xf32>
    %9 = arith.maximumf %7, %8 : vector<8x64xf32>
    %10 = arith.truncf %9 : vector<8x64xf32> to vector<8x64xbf16>
    %c0_6 = arith.constant 0 : index
    %c0_7 = arith.constant 0 : index
    %11 = vector.load %arg4[%c0_6, %c0_7] : memref<64x32xbf16, #tpu.memory_space<vmem>>, vector<64x32xbf16>
    %cst_8 = arith.constant dense<0.000000e+00> : vector<8x32xf32>
    %12 = tpu.matmul %10, %11, %cst_8 {dimension_numbers = #tpu.dot_dimension_numbers<[1], [0], [0], [1], [0, 0, 1, 1], [], []>} : vector<8x64xbf16>, vector<64x32xbf16>, vector<8x32xf32> -> vector<8x32xf32>
    %c0_9 = arith.constant 0 : index
    %c0_10 = arith.constant 0 : index
    %13 = vector.load %arg5[%c0_9, %c0_10] : memref<1x32xbf16, #tpu.memory_space<vmem>>, vector<1x32xbf16>
    %14 = arith.extf %13 : vector<1x32xbf16> to vector<1x32xf32>
    %15 = vector.broadcast %14 : vector<1x32xf32> to vector<8x32xf32>
    %16 = arith.addf %12, %15 : vector<8x32xf32>
    %c0_11 = arith.constant 0 : index
    %c0_12 = arith.constant 0 : index
    %17 = vector.load %arg6[%c0_11, %c0_12] : memref<8x32xf32, #tpu.memory_space<vmem>>, vector<8x32xf32>
    tpu.vector_store %arg6[%c0_11, %c0_12], %16 {strides = array<i32>} : memref<8x32xf32, #tpu.memory_space<vmem>>, vector<8x32xf32>,
    return
  }
  func.func @transform_0(%arg0: i32) -> (i32, i32) {
    %c0_i32 = arith.constant 0 : i32
    %c0_i32_0 = arith.constant 0 : i32
    return %arg0, %c0_i32 : i32, i32
  }
  func.func @transform_1(%arg0: i32) -> (i32, i32) {
    %c0_i32 = arith.constant 0 : i32
    %c0_i32_0 = arith.constant 0 : i32
    %c0_i32_1 = arith.constant 0 : i32
    return %c0_i32, %c0_i32_0 : i32, i32
  }
  func.func @transform_2(%arg0: i32) -> (i32, i32) {
    %c0_i32 = arith.constant 0 : i32
    %c0_i32_0 = arith.constant 0 : i32
    %c0_i32_1 = arith.constant 0 : i32
    return %c0_i32, %c0_i32_0 : i32, i32
  }
  func.func @transform_3(%arg0: i32) -> (i32, i32) {
    %c0_i32 = arith.constant 0 : i32
    %c0_i32_0 = arith.constant 0 : i32
    %c0_i32_1 = arith.constant 0 : i32
    return %c0_i32, %c0_i32_0 : i32, i32
  }
  func.func @transform_4(%arg0: i32) -> (i32, i32) {
    %c0_i32 = arith.constant 0 : i32
    %c0_i32_0 = arith.constant 0 : i32
    %c0_i32_1 = arith.constant 0 : i32
    return %c0_i32, %c0_i32_0 : i32, i32
  }
  func.func @transform_5(%arg0: i32) -> (i32, i32) {
    %c0_i32 = arith.constant 0 : i32
    %c0_i32_0 = arith.constant 0 : i32
    return %arg0, %c0_i32 : i32, i32
  }
}

</mosaic_0001>

<bundles_post_ra>
// kernel: tpu_custom_call.1
= control target key start
LH: loop header
LB: loop body
LE: loop exit
PB: predicated region body
PF: predicated region fallthrough
CT: control target
= control target key end

     0   :  { %10 = vsyncpa [#allocation3], 0  ;;  %s763_s0 = inlined_call_operand.vmem [shape: f32[16,32], index: 0, kind: input, shape index: {}]   ;;  %s764_s1 = inlined_call_operand.vmem [shape: bf16[32,64], index: 1, kind: input, shape index: {}]   ;;  %s765_s2 = inlined_call_operand.vmem [shape: bf16[1,64], index: 2, kind: input, shape index: {}]   ;;  %s766_s3 = inlined_call_operand.vmem [shape: bf16[64,32], index: 3, kind: input, shape index: {}]   ;;  %s767_s4 = inlined_call_operand.vmem [shape: bf16[1,32], index: 4, kind: input, shape index: {}]   ;;  %s768_s5 = inlined_call_operand.hbm [shape: f32[16,32], index: 5, kind: output, shape index: {}]  }
   0x1   :  { %12 = vsyncpa [#allocation3 + $0x1], 0  ;;  %s637_s18 = smov 0   ;;  %s639_s19 = smov 0  }
   0x2   :  { %s641_s20 = smov 0   ;;  %s643_s21 = smov 0  }
   0x3 LB: > { %s658_s22 = sadd.s32 4294967295, %s602_s21   ;;  %s447_s23 = sadd.s32 4294967294, %s602_s21   ;;  %s602_s21 = sphi %s643_s21, %s774_s21   ;;  %s598_s20 = sphi %s641_s20, %s773_s20   ;;  %s594_s19 = sphi %s639_s19, %s772_s19   ;;  %s590_s18 = sphi %s637_s18, %s771_s18  }
   0x4   : > { %s662_s24 = sadd.s32 1, %s602_s21   ;;  %s135_s25 = sadd.s32 1, %s598_s20 }
   0x5   : > { %s132_s26 = ssub.s32 %s602_s21, %s662_s24  ;;  %p145_p0 = scmp.ne.s32.totalorder %s598_s20, %s594_s19 }
   0x6   : > { %p133_p1 = scmp.eq.s32.totalorder %s132_s26, 0  ;;  %p146_p2 = scmp.eq.s32.totalorder %s658_s22, 1 }
   0x7   : > { %p151_p3 = scmp.ne.s32.totalorder %s594_s19, %s590_s18  ;;  %p152_p4 = scmp.eq.s32.totalorder %s447_s23, 1 }
   0x8   : > { %s673_s27 = scalar_select %p133_p1, %s598_s20, %s135_s25  }
   0x9   : > { %p675_p5 = por %p146_p2, %p145_p0  ;;  %p679_p6 = por %p152_p4, %p151_p3 }
   0xa   : > { %p450_p7 = scmp.ge.s32.totalorder %s602_s21, 1  ;;  %p189_p8 = scmp.lt.s32.totalorder %s602_s21, 3 }
   0xc   : > { %p190_p9 = pnand %p450_p7, %p189_p8 }
   0xd   : > { %v534_v0 = vld [vmem:[%s764_s1] sm:$0xff] (!%p190_p9)   ;;  %v604_v1 = vmov (!%p190_p9), 0.0   ;;  %v535_v2 = vld [vmem:[%s764_s1 + $0x8] sm:$0xff] (!%p190_p9)   ;;  %vm605_vm0 = vmmov (!%p190_p9), 0   ;;  %p216_p10 = scmp.lt.s32.totalorder (!%p190_p9), %s658_s22, 1  ;;  %vm245_vm1 = vcmask (!%p190_p9), 261120   ;;  %v229_v9 = vlaneseq (!%p190_p9) }
   0xe   : > { %193 = sbr.rel (%p190_p9) target bundleno = 474 (0x1da), region = 40  ;;  %473 = vmatprep.subr.bf16.mxu0 (!%p190_p9), %v604_v1  ;;  %481 = vmatprep.subr.bf16.mxu1 (!%p190_p9), %v604_v1  ;;  %v536_v3 = vld [vmem:[%s766_s3] sm:$0xff] (!%p190_p9)   ;;  %v537_v4 = vld [vmem:[%s766_s3 + $0x8] sm:$0xff] (!%p190_p9)   ;;  %v538_v7 = vld [vmem:[%s766_s3 + $0x10] sm:$0xff] (!%p190_p9)   ;;  %vm329_vm2 = vcmask (!%p190_p9), 523264   ;;  %s213_s8 = sand.u32 (!%p190_p9), 1, %s594_s19  }
   0xf   : > { %474 = vmatpush3.bf16.msra.mxu0 (!%p190_p9), %v534_v0  ;;  %477 = vmatprep.mubr.msk.bf16.mxu0 (!%p190_p9), %vm605_vm0, %v604_v1  ;;  %v539_v8 = vld [vmem:[%s766_s3 + $0x18] sm:$0xff] (!%p190_p9)   ;;  %v230_v10 = vshrl.u32 (!%p190_p9), %v229_v9, 7  ;;  %v227_v11 = vld [vmem:[%s765_s2] sm:$0x1] (!%p190_p9)  ;;  %s462_s12 = sshll.u32 (!%p190_p9), %s658_s22, 7  ;;  %s606_s25 = smov (!%p190_p9), [#allocation2]  }
  0x10   : > { %475 = vmatprep.subr.bf16.mxu0 (!%p190_p9), %v604_v1  ;;  %489 = vmatprep.mubr.msk.bf16.mxu1 (!%p190_p9), %vm605_vm0, %v604_v1  ;;  %v228_v12 = vunpack.c.l.bf16 (!%p190_p9), %v227_v11  ;;  %v299_v22 = vld [vmem:[%s767_s4] sm:$0x1] (!%p190_p9)  ;;  %s544_s26 = sshll.u32 (!%p190_p9), %s606_s25, 4  ;;  %s545_s26 = int_to_ptr.vmem [resolvable:$false] %s544_s26 }
  0x11   : > { %482 = vmatpush3.bf16.msra.mxu1 (!%p190_p9), %v536_v3  ;;  %v231_v13 = vsub.s32 (!%p190_p9), 0, %v230_v10  ;;  %v300_v23 = vunpack.c.l.bf16 (!%p190_p9), %v299_v22  ;;  %s546_s30 = scalar_lea.vmem (!%p190_p9), %s545_s26, 256 }
  0x12   : > { %483 = vmatprep.subr.bf16.mxu1 (!%p190_p9), %v604_v1 }
  0x13   : > { %476 = vmatpush3.bf16.msra.mxu0 (!%p190_p9), %v535_v2  ;;  %v232_v14 = vrot.slane (!%p190_p9), %v228_v12, %v231_v13  ;;  %v304_v24 = vrot.slane (!%p190_p9), %v300_v23, %v231_v13 }
  0x15   : > { %s217_s11 = scalar_select %p216_p10, %s658_s22, 1  ;;  %484 = vmatpush3.bf16.msra.mxu1 %v537_v4 }
  0x16   : > { %485 = vmatprep.subr.bf16.mxu1 %v604_v1  ;;  %s375_s22 = scalar_lea.sflag [#allocation3], %s213_s8 }
  0x17   : > { %s452_s14 = sshll.u32 %s217_s11, 3  ;;  %s451_s11 = sshll.u32 %s213_s8, 3 }
  0x18   : > { %s219_s17 = scalar_lea.vmem %s763_s0, %s452_s14  ;;  %s215_s13 = scalar_lea.vmem [#allocation2], %s451_s11 }
  0x19   : > { %v221_v5 = vld [vmem:[%s219_s17] sm:$0xff]  ;;  %486 = vmatpush3.bf16.msra.mxu1 %v538_v7  ;;  %s388_s14 = sshll.u32 %s215_s13, 4  ;;  %s720_s17 = scalar_lea.hbm %s768_s5, %s462_s12  ;;  %s722_s14 = int_to_ptr.vmem [resolvable:$true] %s388_s14 }
  0x1a   : > { %v222_v6 = vpack.c.bf16 %v221_v5, %v221_v5  ;;  %487 = vmatprep.subr.bf16.mxu1 %v604_v1  ;;  %s540_s23 = scalar_lea.vmem %s722_s14, 128  ;;  %p547_p0 = scmp.lt.s32.totalorder %s722_s14, %s545_s26 }
  0x1b   : > { %p541_p11 = scmp.ne.s32.totalorder %s722_s14, %s540_s23  ;;  %p548_p1 = scmp.lt.s32.totalorder %s546_s30, %s540_s23 }
  0x1c   : > { %478 = vmatmul.mubr.msk.bf16.vlgmr.msra.gmra.mrb[0].mxu0 %vm245_vm1, %v222_v6 }
  0x1d   : > { %488 = vmatpush3.bf16.msra.mxu1 %v539_v8  ;;  %p542_p12 = pnand %p541_p11, %p675_p5  ;;  %p549_p2 = por %p548_p1, %p547_p0 }
  0x1f   : > { %p543_p13 = pneg %p542_p12 }
  0x21   : > { %p550_p3 = pnand %p549_p2, %p543_p13 }
  0xef   : > { %v283_v15 = vpop.f32.mrb[0].mxu0 }
  0xf0   : > { %v284_v16 = vadd.f32 %v283_v15, %v232_v14  ;;  %v479_v17 = vpop.f32.mrb[1].mxu0 }
  0xf1   : > { %v286_v18 = vpop.f32.mrb[2].mxu0 }
  0xf2   : > { %v289_v19 = vmax.f32 %v284_v16, 0.0  ;;  %v480_v20 = vpop.f32.mrb[3].mxu0 }
  0xf4   : > { %v290_v21 = vpack.c.bf16 %v289_v19, %v289_v19 }
  0xf6   : > { %490 = vmatmul.mubr.msk.bf16.vlgmr.msra.gmra.mrb[0].mxu1 %vm329_vm2, %v290_v21 }
 0x1c9   : > { %v367_v25 = vpop.f32.mrb[0].mxu1 }
 0x1ca   : > { %v368_v26 = vadd.f32 %v367_v25, %v304_v24  ;;  %v491_v27 = vpop.f32.mrb[1].mxu1 }
 0x1cb   : > { %v370_v28 = vpop.f32.mrb[2].mxu1 }
 0x1cc   : > { %v492_v29 = vpop.f32.mrb[3].mxu1  ;;  %373 = vst.msk [vmem:[%s215_s13] sm:$0xff] %vm245_vm1, %v368_v26 }
 0x1cd   : > { %553 = shalt.err (!%p550_p3)
}
 0x1ce   : > { %s554_s6 = scalar_lea.hbm %s720_s17, 128  ;;  %s558_s9 = scalar_lea.hbm %s768_s5, 256 }
 0x1cf   : > { %p555_p4 = scmp.ne.s32.totalorder %s720_s17, %s554_s6  ;;  %p559_p9 = scmp.lt.u32.totalorder %s720_s17, %s768_s5 }
 0x1d0   : > { %p560_p10 = scmp.lt.u32.totalorder %s558_s9, %s554_s6  ;;  %p562_p12 = scmp.lt.u32.totalorder %s554_s6, %s720_s17 }
 0x1d1   : > { %p556_p7 = pnand %p555_p4, %p675_p5 }
 0x1d2   : > { %p561_p11 = por %p560_p10, %p559_p9 }
 0x1d3   : > { %p557_p8 = pneg %p556_p7 }
 0x1d4   : > { %p563_p13 = por %p562_p12, %p561_p11 }
 0x1d6   : > { %p564_p0 = pnand %p563_p13, %p557_p8 }
 0x1d8   : > { %567 = shalt.err (!%p564_p0)
}
 0x1d9   : > { %493 = dma.vmem_to_hbm [thread:$0]  (%p675_p5), %s722_s14, 128, %s720_s17, %s375_s22  }
 0x1da PF: > { %p499_p1 = scmp.ge.s32.totalorder %s602_s21, 2  ;;  %s400_s12 = sand.u32 1, %s590_s18  }
 0x1db   : > { %s401_s13 = scalar_lea.sflag [#allocation3], %s400_s12 }
 0x1dc   : > { %p496_p2 = pnand %p499_p1, %p679_p6 }
 0x1de   : > { %585 = dma.done.wait (!%p496_p2), %s401_s13, 128  }
 0x1df   : > { %587 = vsyncadd (!%p496_p2), %s401_s13, 4294967168  ;;  %p15_p3 = scmp.ge.s32.totalorder %s662_s24, 4   ;;  %s771_s18 = smov %s594_s19 }
 0x1e0   : > { %s772_s19 = smov %s598_s20  ;;  %s773_s20 = smov %s673_s27 }
 0x1e1   : > { %s774_s21 = smov %s662_s24  ;;  %17 = sbr.rel (!%p15_p3) target bundleno = 3 (0x3), region = 75 }
 0x1e8   :  { %406 = vsyncpa [#allocation3], 1 }
 0x1e9   :  { %408 = vsyncpa [#allocation3 + $0x1], 1 }

</bundles_post_ra>
